<compile_context>
chip_gen: v6e
topology: v6e:2x2x1
jax: 0.10.0
libtpu: 0.0.40
codegen_flags: <defaults>
</compile_context>

<pallas_src>
import functools

import jax
import jax.numpy as jnp
from jax.experimental import pallas as pl
from jax.experimental.pallas import tpu as pltpu


def _conv_matmul_kernel(p_ref, w_ref, b_ref, o_ref):
    # p_ref: (K, tile_n)    bf16 -- im2col patch columns for this N tile
    # w_ref: (Cout, K)      bf16 -- all KH*KW*Cin taps fused into one matrix
    # b_ref: (Cout, 1)      f32  -- bias, lane-broadcast in-register
    # o_ref: (Cout, tile_n) bf16
    acc = jnp.dot(w_ref[...], p_ref[...], preferred_element_type=jnp.float32)
    acc = acc + b_ref[...]                      # (Cout,1) broadcasts along lanes
    o_ref[...] = jnp.maximum(acc, 0.0).astype(o_ref.dtype)


@functools.partial(jax.jit, static_argnames=("padding", "out_dtype"))
def conv2d_bias_relu_pallas(x_nchw, weight_oihw, bias, *, padding=1,
                            out_dtype=jnp.bfloat16):
    """inner.forward: Conv2d(stride=1, pad=`padding`) + bias + ReLU, NCHW in/out."""
    B, C, H, W = x_nchw.shape
    Cout, Cin, KH, KW = weight_oihw.shape
    assert C == Cin
    N = B * H * W                 # batch rides on the matmul N (lane) axis
    K = Cin * KH * KW             # single fused contraction axis

    # ---- layout prep (fused by XLA under jit) -------------------------------
    # im2col patch matrix, rows ordered (ci, kh, kw) to match
    # weight_oihw.reshape(Cout, Cin*KH*KW); columns ordered (b, h, w).
    xp = jnp.pad(x_nchw,
                 ((0, 0), (0, 0), (padding, padding), (padding, padding)))
    taps = jnp.stack([xp[:, :, kh:kh + H, kw:kw + W]
                      for kh in range(KH) for kw in range(KW)], axis=2)
    # taps: (B, Cin, KH*KW, H, W) with taps[b,ci,t,h,w] = xp[b,ci,h+kh,w+kw]
    patches = taps.transpose(1, 2, 0, 3, 4).reshape(K, N).astype(jnp.bfloat16)
    w2 = weight_oihw.reshape(Cout, K).astype(jnp.bfloat16)
    b2 = bias.astype(jnp.float32).reshape(Cout, 1)

    # ---- N tiling: one step at the toy shape, 128-multiple tiles when large -
    tile_n = N
    if N > 2048:
        for cand in (2048, 1024, 512):
            if N % cand == 0:
                tile_n = cand
                break
    num_tiles = N // tile_n

    # ---- fused Pallas kernel: one matmul + bias + ReLU ----------------------
    out = pl.pallas_call(
        _conv_matmul_kernel,
        out_shape=jax.ShapeDtypeStruct((Cout, N), out_dtype),
        grid=(num_tiles,),
        in_specs=[
            pl.BlockSpec((K, tile_n), lambda n: (0, n)),      # patch tile
            pl.BlockSpec((Cout, K), lambda n: (0, 0)),        # resident weights
            pl.BlockSpec((Cout, 1), lambda n: (0, 0)),        # resident bias
        ],
        out_specs=pl.BlockSpec((Cout, tile_n), lambda n: (0, n)),
        compiler_params=pltpu.CompilerParams(
            dimension_semantics=("parallel",)),
    )(patches, w2, b2)

    # columns are (b, h, w)-ordered -> tiny XLA permute back to NCHW.
    return out.reshape(Cout, B, H, W).transpose(1, 0, 2, 3)


class LegacyTracedModuleJAX:
    """JAX analogue of torch.jit.LegacyTracedModule.

    forward(*args) -> (trace, out): runs the wrapped `inner` on the inputs and
    returns the captured trace alongside the output.
    """

    def __init__(self, inner_apply, params, nderivs=0):
        self.inner = inner_apply
        self.params = params
        self.nderivs = nderivs   # kept for parity with the torch signature
        # jit the hot path once; params are closed over (module state).
        self._fn = jax.jit(lambda *a: inner_apply(*a, **params))
        self._trace_cache = {}

    def forward(self, *args):
        # TODO(synk): torch._C._tracer_enter/_tracer_exit (JIT graph capture)
        # has no Pallas equivalent; a cached jaxpr of the inner forward is
        # returned as the "trace" stand-in (no per-call retracing).
        key = tuple((tuple(a.shape), str(a.dtype)) for a in args)
        trace = self._trace_cache.get(key)
        if trace is None:
            trace = jax.make_jaxpr(self._fn)(*args)
            self._trace_cache[key] = trace
        out = self._fn(*args)
        return trace, out

    __call__ = forward


if __name__ == "__main__":
    key = jax.random.PRNGKey(0)
    kx, kw, kb = jax.random.split(key, 3)

    B, Cin, H, W = 2, 4, 16, 16
    Cout, KH, KW = 8, 3, 3

    x = jax.random.normal(kx, (B, Cin, H, W), dtype=jnp.float32)
    weight = jax.random.normal(kw, (Cout, Cin, KH, KW), dtype=jnp.float32) * 0.1
    bias = jax.random.normal(kb, (Cout,), dtype=jnp.float32) * 0.1

    module = LegacyTracedModuleJAX(
        conv2d_bias_relu_pallas, params=dict(weight_oihw=weight, bias=bias))

    trace, out = module(x)
    out = jax.block_until_ready(out)

    # sanity check against a pure-JAX reference conv (f32); bf16 MXU inputs and
    # bf16 output writeback sit well inside 2e-2.
    ref = jax.lax.conv_general_dilated(
        x, weight, window_strides=(1, 1), padding=((1, 1), (1, 1)),
        dimension_numbers=("NCHW", "OIHW", "NCHW"))
    ref = jnp.maximum(ref + bias[None, :, None, None], 0.0)
    assert out.shape == (B, Cout, H, W)
    assert jnp.allclose(out.astype(jnp.float32), ref, rtol=2e-2, atol=2e-2)

    print("KERNEL_OK")
</pallas_src>

<mosaic_0001>
module attributes {stable_mosaic.version = 11 : i64} {
  func.func @_conv_matmul_kernel(%arg0: i32, %arg1: memref<36x512xbf16, #tpu.memory_space<vmem>>, %arg2: memref<8x36xbf16, #tpu.memory_space<vmem>>, %arg3: memref<8x1xf32, #tpu.memory_space<vmem>>, %arg4: memref<8x512xbf16, #tpu.memory_space<vmem>>) attributes {dimension_semantics = [#tpu.dimension_semantics<parallel>], iteration_bounds = array<i64: 1>, scalar_prefetch = 0 : i64, scratch_operands = 0 : i64, tpu.core_type = #tpu.core_type<tc>, window_params = [{transform_indices = @transform_0, window_bounds = array<i64: 36, 512>}, {pipeline_mode = #tpu.pipeline_mode<synchronous>, transform_indices = @transform_1, window_bounds = array<i64: 8, 36>}, {pipeline_mode = #tpu.pipeline_mode<synchronous>, transform_indices = @transform_2, window_bounds = array<i64: 8, 1>}, {transform_indices = @transform_3, window_bounds = array<i64: 8, 512>}]} {
    %c0 = arith.constant 0 : index
    %c0_0 = arith.constant 0 : index
    %0 = vector.load %arg2[%c0, %c0_0] : memref<8x36xbf16, #tpu.memory_space<vmem>>, vector<8x36xbf16>
    %c0_1 = arith.constant 0 : index
    %c0_2 = arith.constant 0 : index
    %1 = vector.load %arg1[%c0_1, %c0_2] : memref<36x512xbf16, #tpu.memory_space<vmem>>, vector<36x512xbf16>
    %cst = arith.constant dense<0.000000e+00> : vector<8x512xf32>
    %2 = tpu.matmul %0, %1, %cst {dimension_numbers = #tpu.dot_dimension_numbers<[1], [0], [0], [1], [0, 0, 1, 1], [], []>} : vector<8x36xbf16>, vector<36x512xbf16>, vector<8x512xf32> -> vector<8x512xf32>
    %c0_3 = arith.constant 0 : index
    %c0_4 = arith.constant 0 : index
    %3 = vector.load %arg3[%c0_3, %c0_4] : memref<8x1xf32, #tpu.memory_space<vmem>>, vector<8x1xf32>
    %4 = vector.broadcast %3 : vector<8x1xf32> to vector<8x512xf32>
    %5 = arith.addf %2, %4 : vector<8x512xf32>
    %cst_5 = arith.constant 0.000000e+00 : f32
    %6 = vector.broadcast %cst_5 : f32 to vector<8x512xf32>
    %7 = arith.maximumf %5, %6 : vector<8x512xf32>
    %8 = arith.truncf %7 : vector<8x512xf32> to vector<8x512xbf16>
    %c0_6 = arith.constant 0 : index
    %c0_7 = arith.constant 0 : index
    %9 = vector.load %arg4[%c0_6, %c0_7] : memref<8x512xbf16, #tpu.memory_space<vmem>>, vector<8x512xbf16>
    tpu.vector_store %arg4[%c0_6, %c0_7], %8 {strides = array<i32>} : memref<8x512xbf16, #tpu.memory_space<vmem>>, vector<8x512xbf16>,
    return
  }
  func.func @transform_0(%arg0: i32) -> (i32, i32) {
    %c0_i32 = arith.constant 0 : i32
    %c0_i32_0 = arith.constant 0 : i32
    return %c0_i32, %arg0 : i32, i32
  }
  func.func @transform_1(%arg0: i32) -> (i32, i32) {
    %c0_i32 = arith.constant 0 : i32
    %c0_i32_0 = arith.constant 0 : i32
    %c0_i32_1 = arith.constant 0 : i32
    return %c0_i32, %c0_i32_0 : i32, i32
  }
  func.func @transform_2(%arg0: i32) -> (i32, i32) {
    %c0_i32 = arith.constant 0 : i32
    %c0_i32_0 = arith.constant 0 : i32
    %c0_i32_1 = arith.constant 0 : i32
    return %c0_i32, %c0_i32_0 : i32, i32
  }
  func.func @transform_3(%arg0: i32) -> (i32, i32) {
    %c0_i32 = arith.constant 0 : i32
    %c0_i32_0 = arith.constant 0 : i32
    return %c0_i32, %arg0 : i32, i32
  }
}

</mosaic_0001>

<bundles_post_ra>
// kernel: conv2d_bias_relu_pallas.1
= control target key start
LH: loop header
LB: loop body
LE: loop exit
PB: predicated region body
PF: predicated region fallthrough
CT: control target
= control target key end

     0   :  { %vm86_vm0 = vcmask 1041408   ;;  %v245_v2 = vmov 0   ;;  %vm82_vm1 = vcmask 293888   ;;  %s308_s0 = inlined_call_operand.vmem [shape: bf16[36,512], index: 0, kind: input, shape index: {}]   ;;  %s309_s2 = inlined_call_operand.vmem [shape: f32[8,1], index: 2, kind: input, shape index: {}]   ;;  %s310_s1 = inlined_call_operand.vmem [shape: bf16[8,36], index: 1, kind: input, shape index: {}]   ;;  %s311_s3 = inlined_call_operand.vmem [shape: bf16[8,512], index: 3, kind: output, shape index: {}]  }
   0x1   :  { %v24_v0 = vld [vmem:[%s308_s0 + $0x40] sm:$0x33]  ;;  %v25_v1 = vld [vmem:[%s308_s0 + $0x48] sm:$0x33]  ;;  %131 = vmatprep.mubr.bf16.mxu0 %v245_v2  ;;  %172 = vmatprep.mubr.bf16.mxu1 %v245_v2 }
   0x2   :  { %v216_v3 = vcombine.high %v24_v0, %v24_v0  ;;  %v218_v4 = vcombine.high %v25_v1, %v25_v1  ;;  %v215_v5 = vcombine.low %v24_v0, %v24_v0  ;;  %v217_v6 = vcombine.low %v25_v1, %v25_v1  ;;  %v233_v7 = vld [vmem:[%s308_s0 + $0x24] ss:$16 sps:$4 sm:$0xff]   ;;  %228 = vset.pattern.permute.xlu0 %v245_v2  ;;  %v235_v8 = vld [vmem:[%s308_s0 + $0x2c] ss:$16 sps:$4 sm:$0xff]   ;;  %v237_v11 = vld [vmem:[%s308_s0 + $0x20] ss:$16 sps:$4 sm:$0xff]  }
   0x3   :  { %v238_v12 = vld [vmem:[%s308_s0 + $0x28] ss:$16 sps:$4 sm:$0xff]   ;;  %v239_v13 = vld [vmem:[%s308_s0 + $0x4] ss:$16 sps:$4 sm:$0xff]   ;;  %v241_v14 = vld [vmem:[%s308_s0 + $0xc] ss:$16 sps:$4 sm:$0xff]  }
   0x4   :  { %219 = vmatprep.subr.msk.bf16.mxu0 %vm86_vm0, %v216_v3  ;;  %221 = vmatprep.subr.msk.bf16.mxu1 %vm86_vm0, %v218_v4  ;;  %v88_v9 = vsel %vm86_vm0, %v215_v5, 0  ;;  %v94_v10 = vsel %vm86_vm0, %v217_v6, 0  ;;  %v26_v15 = vld [vmem:[%s309_s2] sm:$0xff]  ;;  %v244_v17 = vld [vmem:[%s308_s0 + $0x8] ss:$16 sps:$4 sm:$0xff]  }
   0x5   :  { %110 = vmatpush1.bf16.msra.mxu0 %v88_v9  ;;  %151 = vmatpush1.bf16.msra.mxu1 %v94_v10  ;;  %v243_v16 = vld [vmem:[%s308_s0] ss:$16 sps:$4 sm:$0xff]  }
   0x6   :  { %111 = vmatprep.subr.bf16.mxu0 %v233_v7  ;;  %152 = vmatprep.subr.bf16.mxu1 %v235_v8  ;;  %v15_v18 = vld [vmem:[%s310_s1] sm:$0xf] }
   0x7   :  { %29 = vperm.xlu0 %228, %v26_v15  }
   0x9   :  { %112 = vmatpush1.bf16.msra.mxu0 %v237_v11  ;;  %153 = vmatpush1.bf16.msra.mxu1 %v238_v12 }
   0xa   :  { %113 = vmatprep.subr.bf16.mxu0 %v239_v13  ;;  %154 = vmatprep.subr.bf16.mxu1 %v241_v14 }
   0xd   :  { %114 = vmatpush1.bf16.msra.mxu0 %v243_v16  ;;  %155 = vmatpush1.bf16.msra.mxu1 %v244_v17 }
  0x10   :  { %220 = vmatmul.mubr.msk.bf16.vlgmr.msra.gmra.mxu0 %vm82_vm1, %v15_v18  ;;  %222 = vmatmul.mubr.msk.bf16.vlgmr.msra.gmra.mxu1 %vm82_vm1, %v15_v18 }
  0x82   :  { %v30_v19 = vpop.permute.xlu0 %29 }
  0xd0   :  { %v133_v20 = vpop.f32.mrf.mxu0  ;;  %v174_v21 = vpop.f32.mrf.mxu1 }
  0xd1   :  { %v134_v22 = vadd.f32 %v133_v20, %v30_v19  ;;  %v175_v23 = vadd.f32 %v174_v21, %v30_v19 }
  0xd2   :  { %v135_v24 = vpop.f32.mrf.mxu0  ;;  %v176_v25 = vpop.f32.mrf.mxu1 }
  0xd3   :  { %v136_v26 = vadd.f32 %v135_v24, %v30_v19  ;;  %v177_v27 = vadd.f32 %v176_v25, %v30_v19  ;;  %v181_v30 = vmax.f32 %v134_v22, 0.0  ;;  %v183_v31 = vmax.f32 %v175_v23, 0.0 }
  0xd4   :  { %v137_v28 = vpop.f32.mrf.mxu0  ;;  %v178_v29 = vpop.f32.mrf.mxu1 }
  0xd5   :  { %v182_v32 = vmax.f32 %v136_v26, 0.0  ;;  %v184_v33 = vmax.f32 %v177_v27, 0.0 }
  0xd6   :  { %v138_v34 = vpop.f32.mrf.mxu0  ;;  %v179_v35 = vpop.f32.mrf.mxu1 }
  0xd7   :  { %v225_v36 = vpack.c.bf16 %v182_v32, %v181_v30  ;;  %v226_v37 = vpack.c.bf16 %v184_v33, %v183_v31 }
  0xd9   :  { %201 = vst [vmem:[%s311_s3] sm:$0xff] %v225_v36  ;;  %202 = vst [vmem:[%s311_s3 + $0x8] sm:$0xff] %v226_v37 }

</bundles_post_ra>
